<compile_context>
chip_gen: v7x
topology: tpu7x:2x2x1
jax: 0.10.0
libtpu: 0.0.40
codegen_flags: <defaults>
</compile_context>

<pallas_src>
import math
import functools

import jax
import jax.numpy as jnp
from jax import lax
from jax.experimental import pallas as pl
from jax.experimental.pallas import tpu as pltpu


def _self_attention_kernel(num_heads, head_dim, seq_len, q_tile,
                           x_ref, w_in_ref, b_in_ref, wo_ref, bo_ref,
                           out_ref, k_cache, v_cache):
    # x_ref   : (S_pad, E) bf16   full (padded) sequence for this batch elem
    # w_in_ref: (3, E, E)  bf16   stacked [Wq*scale, Wk, Wv]
    # b_in_ref: (3, 1, E)  f32    stacked [bq*scale, bk, bv]
    # wo_ref  : (E, E)     bf16 ; bo_ref: (1, E) f32
    # k_cache / v_cache: (S_pad, E) bf16 VMEM scratch (persist across qi steps)
    qi = pl.program_id(1)
    s_pad = x_ref.shape[0]

    # --- K / V projections: once per batch element, reused by every qi tile.
    @pl.when(qi == 0)
    def _():
        x_all = x_ref[...]                                         # (S_pad, E)
        k = (jnp.dot(x_all, w_in_ref[1], preferred_element_type=jnp.float32)
             + b_in_ref[1])
        v = (jnp.dot(x_all, w_in_ref[2], preferred_element_type=jnp.float32)
             + b_in_ref[2])
        k_cache[...] = k.astype(jnp.bfloat16)
        v_cache[...] = v.astype(jnp.bfloat16)

    # --- Q projection for this query-row tile (full-width, lane-dense). ---
    row0 = pl.multiple_of(qi * q_tile, q_tile)
    xq = x_ref[pl.ds(row0, q_tile), :]                             # (TQ, E) bf16
    # 1/sqrt(head_dim) is pre-folded into w_in[0] / b_in[0] by the wrapper.
    q = (jnp.dot(xq, w_in_ref[0], preferred_element_type=jnp.float32)
         + b_in_ref[0]).astype(jnp.bfloat16)                       # (TQ, E)

    k_all = k_cache[...]                                           # (S_pad, E)
    v_all = v_cache[...]
    wo = wo_ref[...]                                               # (E, E) bf16

    mask_keys = s_pad > seq_len                                    # static
    if mask_keys:
        key_valid = lax.broadcasted_iota(jnp.int32, (1, s_pad), 1) < seq_len

    d = head_dim
    fuse_out = (d % 128 == 0)                                      # static
    o_parts = []
    acc = jnp.zeros(out_ref.shape, dtype=jnp.float32)              # (TQ, E)

    # num_heads is small & static -> unrolled at trace time.
    for h in range(num_heads):
        lo, hi = h * d, (h + 1) * d
        q_h, k_h, v_h = q[:, lo:hi], k_all[:, lo:hi], v_all[:, lo:hi]

        # energy = q_h @ k_h^T without materializing a transpose.
        energy = lax.dot_general(q_h, k_h, (((1,), (1,)), ((), ())),
                                 preferred_element_type=jnp.float32)  # (TQ, S_pad)
        if mask_keys:
            energy = jnp.where(key_valid, energy, -1e30)

        # Numerically stable softmax (f32); normalization deferred until after
        # the PV matmul (scale the small (TQ, d) result, not (TQ, S) probs).
        m = jnp.max(energy, axis=-1, keepdims=True)
        p = jnp.exp(energy - m)
        denom = jnp.sum(p, axis=-1, keepdims=True)                 # (TQ, 1)

        o_h = jnp.dot(p.astype(jnp.bfloat16), v_h,
                      preferred_element_type=jnp.float32)          # (TQ, d)
        # approx reciprocal -> EUP slot; ~1e-3 relative error (documented).
        o_h = o_h * pl.reciprocal(denom, approx=True)

        if fuse_out:
            o_parts.append(o_h.astype(jnp.bfloat16))
        else:
            # fc_out folded per head: y += o_h @ Wo[h*d:(h+1)*d, :]
            acc = acc + jnp.dot(o_h.astype(jnp.bfloat16), wo[lo:hi, :],
                                preferred_element_type=jnp.float32)

    if fuse_out:
        # head_dim % 128 == 0 -> lane-aligned concat is free; one E-wide matmul.
        o_cat = jnp.concatenate(o_parts, axis=-1)                  # (TQ, E) bf16
        acc = jnp.dot(o_cat, wo, preferred_element_type=jnp.float32)

    out_ref[...] = (acc + bo_ref[...]).astype(out_ref.dtype)


def _round_up(x, m):
    return ((x + m - 1) // m) * m


def _pick_seq_tiling(S):
    """(padded sequence length, query-row tile). Avoids tiny-M matmuls and
    caps the (TQ, S) f32 softmax intermediates to a few MiB."""
    if S <= 512:
        s_pad = _round_up(S, 8)
        return s_pad, s_pad
    s_pad = _round_up(S, 128)
    if s_pad >= 4096 or s_pad % 256 != 0:
        return s_pad, 128
    return s_pad, 256


def _vmem_limit_bytes(s_pad, tq, E):
    """Rough resident-set estimate with headroom, capped below v7x's 64 MiB."""
    bf16, f32 = 2, 4
    weights = (3 * E * E + E * E) * bf16 + (3 * E + E) * f32
    x_blk = s_pad * E * bf16
    out_blk = tq * E * f32
    kv_scratch = 2 * s_pad * E * bf16
    est = 2 * (weights + x_blk + out_blk) + kv_scratch   # pipeline double-buffers I/O
    return int(min(max(4 * est, 32 * 1024 * 1024), 48 * 1024 * 1024))


def self_attention_pallas(x, params, num_heads):
    """x: [N, S, E] float32. params: [E, E] in->out weights and [1, E] biases."""
    N, S, E = x.shape
    head_dim = E // num_heads
    assert head_dim * num_heads == E

    scale = 1.0 / math.sqrt(head_dim)

    # Stacked QKV weights / biases; attention scale folded into Wq / bq (free).
    w_in = jnp.stack([params["wq"] * scale, params["wk"], params["wv"]],
                     axis=0).astype(jnp.bfloat16)                  # (3, E, E)
    b_in = jnp.stack([params["bq"] * scale, params["bk"], params["bv"]],
                     axis=0)                                       # (3, 1, E) f32
    wo = params["wo"].astype(jnp.bfloat16)                         # (E, E)
    bo = params["bo"]                                              # (1, E) f32

    s_pad, tq = _pick_seq_tiling(S)
    x_bf = x.astype(jnp.bfloat16)
    if s_pad != S:
        x_bf = jnp.pad(x_bf, ((0, 0), (0, s_pad - S), (0, 0)))

    grid = (N, s_pad // tq)
    kernel = functools.partial(_self_attention_kernel,
                               num_heads, head_dim, S, tq)

    out = pl.pallas_call(
        kernel,
        out_shape=jax.ShapeDtypeStruct((N, s_pad, E), x.dtype),
        grid=grid,
        in_specs=[
            # Full (padded) sequence; block index changes only with n, so it is
            # re-DMA'd once per batch element and the query tile is sliced out
            # of the resident block inside the kernel (no separate xq stream).
            pl.BlockSpec((pl.Squeezed(), s_pad, E), lambda n, qi: (n, 0, 0)),
            pl.BlockSpec((3, E, E), lambda n, qi: (0, 0, 0)),      # wq|wk|wv
            pl.BlockSpec((3, 1, E), lambda n, qi: (0, 0, 0)),      # bq|bk|bv
            pl.BlockSpec((E, E), lambda n, qi: (0, 0)),            # wo
            pl.BlockSpec((1, E), lambda n, qi: (0, 0)),            # bo
        ],
        out_specs=pl.BlockSpec((pl.Squeezed(), tq, E), lambda n, qi: (n, qi, 0)),
        scratch_shapes=[
            pltpu.VMEM((s_pad, E), jnp.bfloat16),                  # K cache
            pltpu.VMEM((s_pad, E), jnp.bfloat16),                  # V cache
        ],
        compiler_params=pltpu.CompilerParams(
            # N parallel -> shards across v7x TensorCores; qi must be
            # "arbitrary" (sequential) so the qi==0 K/V scratch fill is valid.
            dimension_semantics=("parallel", "arbitrary"),
            vmem_limit_bytes=_vmem_limit_bytes(s_pad, tq, E)),
    )(x_bf, w_in, b_in, wo, bo)

    if s_pad != S:
        out = out[:, :S, :]
    return out


def _reference(x, params, num_heads):
    """Pure-JAX f32 reference mirroring the PyTorch forward (mask=None)."""
    N, S, E = x.shape
    d = E // num_heads
    q = x @ params["wq"] + params["bq"][0]
    k = x @ params["wk"] + params["bk"][0]
    v = x @ params["wv"] + params["bv"][0]
    q = q.reshape(N, S, num_heads, d)
    k = k.reshape(N, S, num_heads, d)
    v = v.reshape(N, S, num_heads, d)
    energy = jnp.einsum("nqhd,nkhd->nhqk", q, k) / math.sqrt(d)
    attn = jax.nn.softmax(energy, axis=-1)
    out = jnp.einsum("nhql,nlhd->nqhd", attn, v).reshape(N, S, E)
    return out @ params["wo"] + params["bo"][0]


def _init_params(key, embed_size):
    """Deterministic parameter init (PyTorch-Linear-like uniform bound)."""
    keys = jax.random.split(key, 8)
    bound = 1.0 / math.sqrt(embed_size)

    def lin(kw, kb):
        # weight stored as [in, out] (already transposed vs PyTorch)
        w = jax.random.uniform(kw, (embed_size, embed_size),
                               minval=-bound, maxval=bound, dtype=jnp.float32)
        b = jax.random.uniform(kb, (1, embed_size),
                               minval=-bound, maxval=bound, dtype=jnp.float32)
        return w, b

    wq, bq = lin(keys[0], keys[1])
    wk, bk = lin(keys[2], keys[3])
    wv, bv = lin(keys[4], keys[5])
    wo, bo = lin(keys[6], keys[7])
    return dict(wq=wq, bq=bq, wk=wk, bk=bk, wv=wv, bv=bv, wo=wo, bo=bo)


if __name__ == "__main__":
    N, S, E, H = 2, 8, 32, 4

    key = jax.random.PRNGKey(0)
    kx, kp = jax.random.split(key)
    x = jax.random.normal(kx, (N, S, E), dtype=jnp.float32)
    params = _init_params(kp, E)

    out = self_attention_pallas(x, params, num_heads=H)
    out = jax.block_until_ready(out)

    ref = _reference(x, params, num_heads=H)
    assert out.shape == (N, S, E)
    assert out.dtype == x.dtype
    # bf16 matmul inputs (MXU fast path) + approx reciprocal -> looser
    # tolerance than a pure-f32 softmax.
    max_err = float(jnp.max(jnp.abs(out - ref)))
    assert jnp.allclose(out, ref, atol=3e-2, rtol=3e-2), (
        f"mismatch vs reference (max abs err {max_err:.4e})")

    print("KERNEL_OK")
</pallas_src>

<mosaic_0001>
module attributes {stable_mosaic.version = 11 : i64} {
  func.func @_self_attention_kernel(%arg0: i32, %arg1: i32, %arg2: memref<1x8x32xbf16, #tpu.memory_space<vmem>>, %arg3: memref<3x32x32xbf16, #tpu.memory_space<vmem>>, %arg4: memref<3x1x32xf32, #tpu.memory_space<vmem>>, %arg5: memref<32x32xbf16, #tpu.memory_space<vmem>>, %arg6: memref<1x32xf32, #tpu.memory_space<vmem>>, %arg7: memref<1x8x32xf32, #tpu.memory_space<vmem>>, %arg8: memref<8x32xbf16, #tpu.memory_space<vmem>>, %arg9: memref<8x32xbf16, #tpu.memory_space<vmem>>) attributes {dimension_semantics = [#tpu.dimension_semantics<parallel>, #tpu.dimension_semantics<arbitrary>], iteration_bounds = array<i64: 2, 1>, scalar_prefetch = 0 : i64, scratch_operands = 2 : i64, tpu.core_type = #tpu.core_type<tc>, window_params = [{transform_indices = @transform_0, window_bounds = array<i64: 1, 8, 32>}, {pipeline_mode = #tpu.pipeline_mode<synchronous>, transform_indices = @transform_1, window_bounds = array<i64: 3, 32, 32>}, {pipeline_mode = #tpu.pipeline_mode<synchronous>, transform_indices = @transform_2, window_bounds = array<i64: 3, 1, 32>}, {pipeline_mode = #tpu.pipeline_mode<synchronous>, transform_indices = @transform_3, window_bounds = array<i64: 32, 32>}, {pipeline_mode = #tpu.pipeline_mode<synchronous>, transform_indices = @transform_4, window_bounds = array<i64: 1, 32>}, {transform_indices = @transform_5, window_bounds = array<i64: 1, 8, 32>}]} {
    %c0_i32 = arith.constant 0 : i32
    %0 = arith.cmpi eq, %arg1, %c0_i32 : i32
    %1 = arith.extui %0 : i1 to i32
    %c0_i32_0 = arith.constant 0 : i32
    %2 = arith.cmpi ne, %1, %c0_i32_0 : i32
    scf.if %2 {
      %c0_40 = arith.constant 0 : index
      %c0_41 = arith.constant 0 : index
      %c0_42 = arith.constant 0 : index
      %106 = vector.load %arg2[%c0_40, %c0_41, %c0_42] : memref<1x8x32xbf16, #tpu.memory_space<vmem>>, vector<1x8x32xbf16>
      %107 = vector.shape_cast %106 : vector<1x8x32xbf16> to vector<8x32xbf16>
      %c1 = arith.constant 1 : index
      %c0_43 = arith.constant 0 : index
      %c0_44 = arith.constant 0 : index
      %108 = vector.load %arg3[%c1, %c0_43, %c0_44] : memref<3x32x32xbf16, #tpu.memory_space<vmem>>, vector<1x32x32xbf16>
      %109 = vector.shape_cast %108 : vector<1x32x32xbf16> to vector<32x32xbf16>
      %cst_45 = arith.constant dense<0.000000e+00> : vector<8x32xf32>
      %110 = tpu.matmul %107, %109, %cst_45 {dimension_numbers = #tpu.dot_dimension_numbers<[1], [0], [0], [1], [0, 0, 1, 1], [], []>} : vector<8x32xbf16>, vector<32x32xbf16>, vector<8x32xf32> -> vector<8x32xf32>
      %c1_46 = arith.constant 1 : index
      %c0_47 = arith.constant 0 : index
      %c0_48 = arith.constant 0 : index
      %111 = vector.load %arg4[%c1_46, %c0_47, %c0_48] : memref<3x1x32xf32, #tpu.memory_space<vmem>>, vector<1x1x32xf32>
      %112 = vector.shape_cast %111 : vector<1x1x32xf32> to vector<1x32xf32>
      %113 = vector.broadcast %112 : vector<1x32xf32> to vector<8x32xf32>
      %114 = arith.addf %110, %113 : vector<8x32xf32>
      %c2 = arith.constant 2 : index
      %c0_49 = arith.constant 0 : index
      %c0_50 = arith.constant 0 : index
      %115 = vector.load %arg3[%c2, %c0_49, %c0_50] : memref<3x32x32xbf16, #tpu.memory_space<vmem>>, vector<1x32x32xbf16>
      %116 = vector.shape_cast %115 : vector<1x32x32xbf16> to vector<32x32xbf16>
      %cst_51 = arith.constant dense<0.000000e+00> : vector<8x32xf32>
      %117 = tpu.matmul %107, %116, %cst_51 {dimension_numbers = #tpu.dot_dimension_numbers<[1], [0], [0], [1], [0, 0, 1, 1], [], []>} : vector<8x32xbf16>, vector<32x32xbf16>, vector<8x32xf32> -> vector<8x32xf32>
      %c2_52 = arith.constant 2 : index
      %c0_53 = arith.constant 0 : index
      %c0_54 = arith.constant 0 : index
      %118 = vector.load %arg4[%c2_52, %c0_53, %c0_54] : memref<3x1x32xf32, #tpu.memory_space<vmem>>, vector<1x1x32xf32>
      %119 = vector.shape_cast %118 : vector<1x1x32xf32> to vector<1x32xf32>
      %120 = vector.broadcast %119 : vector<1x32xf32> to vector<8x32xf32>
      %121 = arith.addf %117, %120 : vector<8x32xf32>
      %122 = arith.truncf %114 : vector<8x32xf32> to vector<8x32xbf16>
      %c0_55 = arith.constant 0 : index
      %c0_56 = arith.constant 0 : index
      %123 = vector.load %arg8[%c0_55, %c0_56] : memref<8x32xbf16, #tpu.memory_space<vmem>>, vector<8x32xbf16>
      tpu.vector_store %arg8[%c0_55, %c0_56], %122 {strides = array<i32>} : memref<8x32xbf16, #tpu.memory_space<vmem>>, vector<8x32xbf16>,
      %124 = arith.truncf %121 : vector<8x32xf32> to vector<8x32xbf16>
      %c0_57 = arith.constant 0 : index
      %c0_58 = arith.constant 0 : index
      %125 = vector.load %arg9[%c0_57, %c0_58] : memref<8x32xbf16, #tpu.memory_space<vmem>>, vector<8x32xbf16>
      tpu.vector_store %arg9[%c0_57, %c0_58], %124 {strides = array<i32>} : memref<8x32xbf16, #tpu.memory_space<vmem>>, vector<8x32xbf16>,
    } else {
    }
    %c8_i32 = arith.constant 8 : i32
    %3 = arith.muli %arg1, %c8_i32 : i32
    %4 = tpu.assume_multiple %3, 8 : i32
    %c0 = arith.constant 0 : index
    %5 = arith.index_cast %4 : i32 to index
    %c0_1 = arith.constant 0 : index
    %6 = vector.load %arg2[%c0, %5, %c0_1] : memref<1x8x32xbf16, #tpu.memory_space<vmem>>, vector<1x8x32xbf16>
    %7 = vector.shape_cast %6 : vector<1x8x32xbf16> to vector<8x32xbf16>
    %c0_2 = arith.constant 0 : index
    %c0_3 = arith.constant 0 : index
    %c0_4 = arith.constant 0 : index
    %8 = vector.load %arg3[%c0_2, %c0_3, %c0_4] : memref<3x32x32xbf16, #tpu.memory_space<vmem>>, vector<1x32x32xbf16>
    %9 = vector.shape_cast %8 : vector<1x32x32xbf16> to vector<32x32xbf16>
    %cst = arith.constant dense<0.000000e+00> : vector<8x32xf32>
    %10 = tpu.matmul %7, %9, %cst {dimension_numbers = #tpu.dot_dimension_numbers<[1], [0], [0], [1], [0, 0, 1, 1], [], []>} : vector<8x32xbf16>, vector<32x32xbf16>, vector<8x32xf32> -> vector<8x32xf32>
    %c0_5 = arith.constant 0 : index
    %c0_6 = arith.constant 0 : index
    %c0_7 = arith.constant 0 : index
    %11 = vector.load %arg4[%c0_5, %c0_6, %c0_7] : memref<3x1x32xf32, #tpu.memory_space<vmem>>, vector<1x1x32xf32>
    %12 = vector.shape_cast %11 : vector<1x1x32xf32> to vector<1x32xf32>
    %13 = vector.broadcast %12 : vector<1x32xf32> to vector<8x32xf32>
    %14 = arith.addf %10, %13 : vector<8x32xf32>
    %15 = arith.truncf %14 : vector<8x32xf32> to vector<8x32xbf16>
    %c0_8 = arith.constant 0 : index
    %c0_9 = arith.constant 0 : index
    %16 = vector.load %arg8[%c0_8, %c0_9] : memref<8x32xbf16, #tpu.memory_space<vmem>>, vector<8x32xbf16>
    %c0_10 = arith.constant 0 : index
    %c0_11 = arith.constant 0 : index
    %17 = vector.load %arg9[%c0_10, %c0_11] : memref<8x32xbf16, #tpu.memory_space<vmem>>, vector<8x32xbf16>
    %c0_12 = arith.constant 0 : index
    %c0_13 = arith.constant 0 : index
    %18 = vector.load %arg5[%c0_12, %c0_13] : memref<32x32xbf16, #tpu.memory_space<vmem>>, vector<32x32xbf16>
    %cst_14 = arith.constant 0.000000e+00 : f32
    %19 = vector.broadcast %cst_14 : f32 to vector<8x32xf32>
    %20 = vector.extract_strided_slice %15 {offsets = [0, 0], sizes = [8, 8], strides = [1, 1]} : vector<8x32xbf16> to vector<8x8xbf16>
    %21 = vector.extract_strided_slice %16 {offsets = [0, 0], sizes = [8, 8], strides = [1, 1]} : vector<8x32xbf16> to vector<8x8xbf16>
    %22 = vector.extract_strided_slice %17 {offsets = [0, 0], sizes = [8, 8], strides = [1, 1]} : vector<8x32xbf16> to vector<8x8xbf16>
    %cst_15 = arith.constant dense<0.000000e+00> : vector<8x8xf32>
    %23 = tpu.matmul %20, %21, %cst_15 {dimension_numbers = #tpu.dot_dimension_numbers<[1], [1], [0], [0], [0, 0, 1, 0], [], []>} : vector<8x8xbf16>, vector<8x8xbf16>, vector<8x8xf32> -> vector<8x8xf32>
    %cst_16 = arith.constant dense<0xFF800000> : vector<8xf32>
    %24 = vector.multi_reduction <maximumf>, %23, %cst_16 [1] : vector<8x8xf32> to vector<8xf32>
    %25 = vector.shape_cast %24 : vector<8xf32> to vector<8x1xf32>
    %26 = vector.broadcast %25 : vector<8x1xf32> to vector<8x8xf32>
    %27 = arith.subf %23, %26 : vector<8x8xf32>
    %28 = math.exp %27 : vector<8x8xf32>
    %cst_17 = arith.constant dense<0.000000e+00> : vector<8xf32>
    %29 = vector.multi_reduction <add>, %28, %cst_17 [1] : vector<8x8xf32> to vector<8xf32>
    %30 = vector.shape_cast %29 : vector<8xf32> to vector<8x1xf32>
    %31 = arith.truncf %28 : vector<8x8xf32> to vector<8x8xbf16>
    %cst_18 = arith.constant dense<0.000000e+00> : vector<8x8xf32>
    %32 = tpu.matmul %31, %22, %cst_18 {dimension_numbers = #tpu.dot_dimension_numbers<[1], [0], [0], [1], [0, 0, 1, 1], [], []>} : vector<8x8xbf16>, vector<8x8xbf16>, vector<8x8xf32> -> vector<8x8xf32>
    %33 = tpu.reciprocal %30 {approx = true} : vector<8x1xf32> -> vector<8x1xf32>
    %34 = vector.broadcast %33 : vector<8x1xf32> to vector<8x8xf32>
    %35 = arith.mulf %32, %34 : vector<8x8xf32>
    %36 = arith.truncf %35 : vector<8x8xf32> to vector<8x8xbf16>
    %37 = vector.extract_strided_slice %18 {offsets = [0, 0], sizes = [8, 32], strides = [1, 1]} : vector<32x32xbf16> to vector<8x32xbf16>
    %cst_19 = arith.constant dense<0.000000e+00> : vector<8x32xf32>
    %38 = tpu.matmul %36, %37, %cst_19 {dimension_numbers = #tpu.dot_dimension_numbers<[1], [0], [0], [1], [0, 0, 1, 1], [], []>} : vector<8x8xbf16>, vector<8x32xbf16>, vector<8x32xf32> -> vector<8x32xf32>
    %39 = arith.addf %19, %38 : vector<8x32xf32>
    %40 = vector.extract_strided_slice %15 {offsets = [0, 8], sizes = [8, 8], strides = [1, 1]} : vector<8x32xbf16> to vector<8x8xbf16>
    %41 = vector.extract_strided_slice %16 {offsets = [0, 8], sizes = [8, 8], strides = [1, 1]} : vector<8x32xbf16> to vector<8x8xbf16>
    %42 = vector.extract_strided_slice %17 {offsets = [0, 8], sizes = [8, 8], strides = [1, 1]} : vector<8x32xbf16> to vector<8x8xbf16>
    %cst_20 = arith.constant dense<0.000000e+00> : vector<8x8xf32>
    %43 = tpu.matmul %40, %41, %cst_20 {dimension_numbers = #tpu.dot_dimension_numbers<[1], [1], [0], [0], [0, 0, 1, 0], [], []>} : vector<8x8xbf16>, vector<8x8xbf16>, vector<8x8xf32> -> vector<8x8xf32>
    %cst_21 = arith.constant dense<0xFF800000> : vector<8xf32>
    %44 = vector.multi_reduction <maximumf>, %43, %cst_21 [1] : vector<8x8xf32> to vector<8xf32>
    %45 = vector.shape_cast %44 : vector<8xf32> to vector<8x1xf32>
    %46 = vector.broadcast %45 : vector<8x1xf32> to vector<8x8xf32>
    %47 = arith.subf %43, %46 : vector<8x8xf32>
    %48 = math.exp %47 : vector<8x8xf32>
    %cst_22 = arith.constant dense<0.000000e+00> : vector<8xf32>
    %49 = vector.multi_reduction <add>, %48, %cst_22 [1] : vector<8x8xf32> to vector<8xf32>
    %50 = vector.shape_cast %49 : vector<8xf32> to vector<8x1xf32>
    %51 = arith.truncf %48 : vector<8x8xf32> to vector<8x8xbf16>
    %cst_23 = arith.constant dense<0.000000e+00> : vector<8x8xf32>
    %52 = tpu.matmul %51, %42, %cst_23 {dimension_numbers = #tpu.dot_dimension_numbers<[1], [0], [0], [1], [0, 0, 1, 1], [], []>} : vector<8x8xbf16>, vector<8x8xbf16>, vector<8x8xf32> -> vector<8x8xf32>
    %53 = tpu.reciprocal %50 {approx = true} : vector<8x1xf32> -> vector<8x1xf32>
    %54 = vector.broadcast %53 : vector<8x1xf32> to vector<8x8xf32>
    %55 = arith.mulf %52, %54 : vector<8x8xf32>
    %56 = arith.truncf %55 : vector<8x8xf32> to vector<8x8xbf16>
    %57 = vector.extract_strided_slice %18 {offsets = [8, 0], sizes = [8, 32], strides = [1, 1]} : vector<32x32xbf16> to vector<8x32xbf16>
    %cst_24 = arith.constant dense<0.000000e+00> : vector<8x32xf32>
    %58 = tpu.matmul %56, %57, %cst_24 {dimension_numbers = #tpu.dot_dimension_numbers<[1], [0], [0], [1], [0, 0, 1, 1], [], []>} : vector<8x8xbf16>, vector<8x32xbf16>, vector<8x32xf32> -> vector<8x32xf32>
    %59 = arith.addf %39, %58 : vector<8x32xf32>
    %60 = vector.extract_strided_slice %15 {offsets = [0, 16], sizes = [8, 8], strides = [1, 1]} : vector<8x32xbf16> to vector<8x8xbf16>
    %61 = vector.extract_strided_slice %16 {offsets = [0, 16], sizes = [8, 8], strides = [1, 1]} : vector<8x32xbf16> to vector<8x8xbf16>
    %62 = vector.extract_strided_slice %17 {offsets = [0, 16], sizes = [8, 8], strides = [1, 1]} : vector<8x32xbf16> to vector<8x8xbf16>
    %cst_25 = arith.constant dense<0.000000e+00> : vector<8x8xf32>
    %63 = tpu.matmul %60, %61, %cst_25 {dimension_numbers = #tpu.dot_dimension_numbers<[1], [1], [0], [0], [0, 0, 1, 0], [], []>} : vector<8x8xbf16>, vector<8x8xbf16>, vector<8x8xf32> -> vector<8x8xf32>
    %cst_26 = arith.constant dense<0xFF800000> : vector<8xf32>
    %64 = vector.multi_reduction <maximumf>, %63, %cst_26 [1] : vector<8x8xf32> to vector<8xf32>
    %65 = vector.shape_cast %64 : vector<8xf32> to vector<8x1xf32>
    %66 = vector.broadcast %65 : vector<8x1xf32> to vector<8x8xf32>
    %67 = arith.subf %63, %66 : vector<8x8xf32>
    %68 = math.exp %67 : vector<8x8xf32>
    %cst_27 = arith.constant dense<0.000000e+00> : vector<8xf32>
    %69 = vector.multi_reduction <add>, %68, %cst_27 [1] : vector<8x8xf32> to vector<8xf32>
    %70 = vector.shape_cast %69 : vector<8xf32> to vector<8x1xf32>
    %71 = arith.truncf %68 : vector<8x8xf32> to vector<8x8xbf16>
    %cst_28 = arith.constant dense<0.000000e+00> : vector<8x8xf32>
    %72 = tpu.matmul %71, %62, %cst_28 {dimension_numbers = #tpu.dot_dimension_numbers<[1], [0], [0], [1], [0, 0, 1, 1], [], []>} : vector<8x8xbf16>, vector<8x8xbf16>, vector<8x8xf32> -> vector<8x8xf32>
    %73 = tpu.reciprocal %70 {approx = true} : vector<8x1xf32> -> vector<8x1xf32>
    %74 = vector.broadcast %73 : vector<8x1xf32> to vector<8x8xf32>
    %75 = arith.mulf %72, %74 : vector<8x8xf32>
    %76 = arith.truncf %75 : vector<8x8xf32> to vector<8x8xbf16>
    %77 = vector.extract_strided_slice %18 {offsets = [16, 0], sizes = [8, 32], strides = [1, 1]} : vector<32x32xbf16> to vector<8x32xbf16>
    %cst_29 = arith.constant dense<0.000000e+00> : vector<8x32xf32>
    %78 = tpu.matmul %76, %77, %cst_29 {dimension_numbers = #tpu.dot_dimension_numbers<[1], [0], [0], [1], [0, 0, 1, 1], [], []>} : vector<8x8xbf16>, vector<8x32xbf16>, vector<8x32xf32> -> vector<8x32xf32>
    %79 = arith.addf %59, %78 : vector<8x32xf32>
    %80 = vector.extract_strided_slice %15 {offsets = [0, 24], sizes = [8, 8], strides = [1, 1]} : vector<8x32xbf16> to vector<8x8xbf16>
    %81 = vector.extract_strided_slice %16 {offsets = [0, 24], sizes = [8, 8], strides = [1, 1]} : vector<8x32xbf16> to vector<8x8xbf16>
    %82 = vector.extract_strided_slice %17 {offsets = [0, 24], sizes = [8, 8], strides = [1, 1]} : vector<8x32xbf16> to vector<8x8xbf16>
    %cst_30 = arith.constant dense<0.000000e+00> : vector<8x8xf32>
    %83 = tpu.matmul %80, %81, %cst_30 {dimension_numbers = #tpu.dot_dimension_numbers<[1], [1], [0], [0], [0, 0, 1, 0], [], []>} : vector<8x8xbf16>, vector<8x8xbf16>, vector<8x8xf32> -> vector<8x8xf32>
    %cst_31 = arith.constant dense<0xFF800000> : vector<8xf32>
    %84 = vector.multi_reduction <maximumf>, %83, %cst_31 [1] : vector<8x8xf32> to vector<8xf32>
    %85 = vector.shape_cast %84 : vector<8xf32> to vector<8x1xf32>
    %86 = vector.broadcast %85 : vector<8x1xf32> to vector<8x8xf32>
    %87 = arith.subf %83, %86 : vector<8x8xf32>
    %88 = math.exp %87 : vector<8x8xf32>
    %cst_32 = arith.constant dense<0.000000e+00> : vector<8xf32>
    %89 = vector.multi_reduction <add>, %88, %cst_32 [1] : vector<8x8xf32> to vector<8xf32>
    %90 = vector.shape_cast %89 : vector<8xf32> to vector<8x1xf32>
    %91 = arith.truncf %88 : vector<8x8xf32> to vector<8x8xbf16>
    %cst_33 = arith.constant dense<0.000000e+00> : vector<8x8xf32>
    %92 = tpu.matmul %91, %82, %cst_33 {dimension_numbers = #tpu.dot_dimension_numbers<[1], [0], [0], [1], [0, 0, 1, 1], [], []>} : vector<8x8xbf16>, vector<8x8xbf16>, vector<8x8xf32> -> vector<8x8xf32>
    %93 = tpu.reciprocal %90 {approx = true} : vector<8x1xf32> -> vector<8x1xf32>
    %94 = vector.broadcast %93 : vector<8x1xf32> to vector<8x8xf32>
    %95 = arith.mulf %92, %94 : vector<8x8xf32>
    %96 = arith.truncf %95 : vector<8x8xf32> to vector<8x8xbf16>
    %97 = vector.extract_strided_slice %18 {offsets = [24, 0], sizes = [8, 32], strides = [1, 1]} : vector<32x32xbf16> to vector<8x32xbf16>
    %cst_34 = arith.constant dense<0.000000e+00> : vector<8x32xf32>
    %98 = tpu.matmul %96, %97, %cst_34 {dimension_numbers = #tpu.dot_dimension_numbers<[1], [0], [0], [1], [0, 0, 1, 1], [], []>} : vector<8x8xbf16>, vector<8x32xbf16>, vector<8x32xf32> -> vector<8x32xf32>
    %99 = arith.addf %79, %98 : vector<8x32xf32>
    %c0_35 = arith.constant 0 : index
    %c0_36 = arith.constant 0 : index
    %100 = vector.load %arg6[%c0_35, %c0_36] : memref<1x32xf32, #tpu.memory_space<vmem>>, vector<1x32xf32>
    %101 = vector.broadcast %100 : vector<1x32xf32> to vector<8x32xf32>
    %102 = arith.addf %99, %101 : vector<8x32xf32>
    %c0_37 = arith.constant 0 : index
    %c0_38 = arith.constant 0 : index
    %c0_39 = arith.constant 0 : index
    %103 = vector.load %arg7[%c0_37, %c0_38, %c0_39] : memref<1x8x32xf32, #tpu.memory_space<vmem>>, vector<1x8x32xf32>
    %104 = vector.shape_cast %103 : vector<1x8x32xf32> to vector<8x32xf32>
    %105 = vector.shape_cast %102 : vector<8x32xf32> to vector<1x8x32xf32>
    tpu.vector_store %arg7[%c0_37, %c0_38, %c0_39], %105 {strides = array<i32>} : memref<1x8x32xf32, #tpu.memory_space<vmem>>, vector<1x8x32xf32>,
    return
  }
  func.func @transform_0(%arg0: i32, %arg1: i32) -> (i32, i32, i32) {
    %c0_i32 = arith.constant 0 : i32
    %c0_i32_0 = arith.constant 0 : i32
    %c0_i32_1 = arith.constant 0 : i32
    return %arg0, %c0_i32, %c0_i32_0 : i32, i32, i32
  }
  func.func @transform_1(%arg0: i32, %arg1: i32) -> (i32, i32, i32) {
    %c0_i32 = arith.constant 0 : i32
    %c0_i32_0 = arith.constant 0 : i32
    %c0_i32_1 = arith.constant 0 : i32
    %c0_i32_2 = arith.constant 0 : i32
    return %c0_i32, %c0_i32_0, %c0_i32_1 : i32, i32, i32
  }
  func.func @transform_2(%arg0: i32, %arg1: i32) -> (i32, i32, i32) {
    %c0_i32 = arith.constant 0 : i32
    %c0_i32_0 = arith.constant 0 : i32
    %c0_i32_1 = arith.constant 0 : i32
    %c0_i32_2 = arith.constant 0 : i32
    return %c0_i32, %c0_i32_0, %c0_i32_1 : i32, i32, i32
  }
  func.func @transform_3(%arg0: i32, %arg1: i32) -> (i32, i32) {
    %c0_i32 = arith.constant 0 : i32
    %c0_i32_0 = arith.constant 0 : i32
    %c0_i32_1 = arith.constant 0 : i32
    return %c0_i32, %c0_i32_0 : i32, i32
  }
  func.func @transform_4(%arg0: i32, %arg1: i32) -> (i32, i32) {
    %c0_i32 = arith.constant 0 : i32
    %c0_i32_0 = arith.constant 0 : i32
    %c0_i32_1 = arith.constant 0 : i32
    return %c0_i32, %c0_i32_0 : i32, i32
  }
  func.func @transform_5(%arg0: i32, %arg1: i32) -> (i32, i32, i32) {
    %c0_i32 = arith.constant 0 : i32
    %c0_i32_0 = arith.constant 0 : i32
    return %arg0, %arg1, %c0_i32 : i32, i32, i32
  }
}

</mosaic_0001>

<bundles_post_ra>
// kernel: tpu_custom_call.1
= control target key start
LH: loop header
LB: loop body
LE: loop exit
PB: predicated region body
PF: predicated region fallthrough
CT: control target
= control target key end

     0   :  { %10 = vsyncpa [#allocation5], 0  ;;  %s2145_s0 = inlined_call_operand.hbm [shape: bf16[2,8,32], index: 0, kind: input, shape index: {}]   ;;  %s2146_s1 = inlined_call_operand.hbm [shape: bf16[3,32,32], index: 1, kind: input, shape index: {}]   ;;  %s2147_s2 = inlined_call_operand.vmem [shape: f32[3,1,32], index: 2, kind: input, shape index: {}]   ;;  %s2148_s3 = inlined_call_operand.hbm [shape: bf16[32,32], index: 3, kind: input, shape index: {}]   ;;  %s2149_s4 = inlined_call_operand.vmem [shape: f32[1,32], index: 4, kind: input, shape index: {}]   ;;  %s2150_s5 = inlined_call_operand.hbm [shape: f32[2,8,32], index: 5, kind: output, shape index: {}]  }
   0x1   :  { %12 = vsyncpa [#allocation5 + $0x1], 0 }
   0x2   :  { %13 = vsyncpa [#allocation8], 0 }
   0x3   :  { %14 = vsyncpa [#allocation6], 0 }
   0x4   :  { %16 = vsyncpa [#allocation6 + $0x1], 0  ;;  %s1769_s18 = smov 0   ;;  %s1771_s19 = smov 0  }
   0x5   :  { %s1773_s20 = smov 0   ;;  %s1775_s21 = smov 0  }
   0x6   :  { %s1777_s22 = smov 0   ;;  %s1779_s23 = smov 0  }
   0x7 LB: > { %s1265_s24 = sadd.s32 4294967295, %s1726_s23   ;;  %s1266_s25 = sadd.s32 4294967294, %s1726_s23   ;;  %s1726_s23 = sphi %s1779_s23, %s22_s23   ;;  %s1722_s22 = sphi %s1777_s22, %s2172_s22   ;;  %s1718_s21 = sphi %s1775_s21, %s2171_s21   ;;  %s1714_s20 = sphi %s1773_s20, %s2170_s20   ;;  %s1710_s19 = sphi %s1771_s19, %s2169_s19   ;;  %s1706_s18 = sphi %s1769_s18, %s2168_s18  }
   0x8   : > { %p54_p0 = scmp.ne.s32.totalorder %s1710_s19, %s1706_s18  ;;  %p1803_p1 = scmp.eq.s32.totalorder %s1265_s24, 0 }
   0x9   : > { %p1807_p2 = scmp.eq.s32.totalorder %s1265_s24, 1  ;;  %p170_p3 = scmp.eq.s32.totalorder %s1266_s25, 1 }
   0xa   : > { %s2155_s26 = scalar_select %p1803_p1, 1, 0 }
   0xb   : > { %p1813_p4 = por %p1803_p1, %p54_p0  ;;  %p1267_p5 = scmp.ge.s32.totalorder %s1726_s23, 1 }
   0xc   : > { %p1818_p6 = por %p170_p3, %p54_p0  ;;  %p177_p7 = scmp.lt.s32.totalorder %s1726_s23, 3 }
   0xd   : > { %s2157_s28 = scalar_select %p1813_p4, 1, 0 }
   0xe   : > { %s2158_s29 = scalar_select %p1818_p6, 1, 0 }
   0xf   : > { %p1823_p8 = pnand %p1267_p5, %p177_p7  ;;  %s1728_s6 = smov [#allocation7]  }
  0x10   : > { %s189_s7 = sshll.u32 %s1728_s6, 4  ;;  %s1729_s9 = smov [#allocation9]   ;;  %s1827_s7 = int_to_ptr.vmem [resolvable:$true] %s189_s7 }
  0x11   : > { %p1452_p9 = pneg %p1823_p8  ;;  %s205_s10 = sshll.u32 %s1729_s9, 4  ;;  %s1838_s10 = int_to_ptr.vmem [resolvable:$true] %s205_s10 }
  0x12   : > { %s1554_s13 = scalar_lea.hbm %s2146_s1, 768 }
  0x13   : > { %p1834_p11 = pnand %p1452_p9, %p1803_p1  ;;  %p1555_p12 = scmp.ne.s32.totalorder %s2146_s1, %s1554_s13 }
  0x14   : > { %p1561_p5 = scmp.lt.u32.totalorder %s1554_s13, %s2146_s1 }
  0x15   : > { %p1556_p13 = pneg %p1834_p11 }
  0x17   : > { %p1557_p0 = pnand %p1556_p13, %p1555_p12 }
  0x19   : > { %p1558_p3 = pneg %p1557_p0 }
  0x1b   : > { %p1563_p7 = pnand %p1561_p5, %p1558_p3 }
  0x1d   : > { %1566 = shalt.err (!%p1563_p7)
}
  0x1e   : > { %s1567_s24 = scalar_lea.vmem %s1827_s7, 768  ;;  %p1575_p1 = scmp.lt.s32.totalorder %s1827_s7, %s1827_s7 }
  0x1f   : > { %p1568_p9 = scmp.ne.s32.totalorder %s1827_s7, %s1567_s24  ;;  %p1576_p12 = scmp.lt.s32.totalorder %s1567_s24, %s1567_s24 }
  0x21   : > { %p1570_p10 = pnand %p1568_p9, %p1556_p13  ;;  %p1577_p0 = por %p1576_p12, %p1575_p1 }
  0x23   : > { %p1571_p6 = pneg %p1570_p10 }
  0x25   : > { %p1578_p4 = pnand %p1577_p0, %p1571_p6 }
  0x27   : > { %1581 = shalt.err (!%p1578_p4)
}
  0x28   : > { %s1730_s25 = smov 64   ;;  %s1731_s6 = smov 4  }
  0x29   : > { %1455 = dma.hbm_to_vmem [thread:$0]  (!%p1834_p11), %s2146_s1, 768, %s1827_s7, [#allocation8], %s1730_s25, %s1730_s25, %s1731_s6  }
  0x2a   : > { %s1582_s14 = scalar_lea.hbm %s2148_s3, 256 }
  0x2b   : > { %p1583_p1 = scmp.ne.s32.totalorder %s2148_s3, %s1582_s14  ;;  %p1589_p10 = scmp.lt.u32.totalorder %s1582_s14, %s2148_s3 }
  0x2d   : > { %p1585_p4 = pnand %p1583_p1, %p1556_p13 }
  0x2f   : > { %p1586_p6 = pneg %p1585_p4 }
  0x31   : > { %p1591_p3 = pnand %p1589_p10, %p1586_p6 }
  0x33   : > { %1594 = shalt.err (!%p1591_p3)
}
  0x34   : > { %s1595_s7 = scalar_lea.vmem %s1838_s10, 256  ;;  %p1603_p12 = scmp.lt.s32.totalorder %s1838_s10, %s1838_s10 }
  0x35   : > { %p1596_p5 = scmp.ne.s32.totalorder %s1838_s10, %s1595_s7  ;;  %p1604_p0 = scmp.lt.s32.totalorder %s1595_s7, %s1595_s7 }
  0x37   : > { %p1598_p7 = pnand %p1596_p5, %p1556_p13  ;;  %p1605_p1 = por %p1604_p0, %p1603_p12 }
  0x39   : > { %p1599_p9 = pneg %p1598_p7 }
  0x3b   : > { %p1606_p4 = pnand %p1605_p1, %p1599_p9 }
  0x3d   : > { %1609 = shalt.err (!%p1606_p4)
}
  0x3e   : > { %1458 = dma.hbm_to_vmem [thread:$0]  (!%p1834_p11), %s2148_s3, 256, %s1838_s10, [#allocation8], %s1730_s25, %s1730_s25, %s1731_s6  }
  0x3f   : > { %s34_s12 = sadd.s32 1, %s1722_s22  ;;  %s41_s13 = sadd.s32 1, %s1714_s20 }
  0x40   : > { %p36_p13 = scmp.ge.s32.totalorder %s34_s12, 2  ;;  %p48_p6 = scmp.ne.s32.totalorder %s1714_s20, %s1710_s19 }
  0x41   : > { %p49_p10 = scmp.eq.s32.totalorder %s1726_s23, 0  ;;  %p1469_p3 = scmp.lt.s32.totalorder %s1726_s23, 2 }
  0x42   : > { %s2174_s12 = smov (%p36_p13, %s34_s12), 0  ;;  %p1902_p7 = por %p1807_p2, %p48_p6 }
  0x43   : > { %p50_p5 = por %p49_p10, %p48_p6  ;;  %s38_s14 = ssub.s32 %s1722_s22, %s2174_s12 }
  0x44   : > { %s2161_s8 = scalar_select %p1902_p7, 1, 0 }
  0x45   : > { %s222_s15 = sand.u32 1, %s1714_s20   ;;  %p39_p9 = scmp.eq.s32.totalorder %s38_s14, 0 }
  0x46   : > { %s1271_s10 = sshll.u32 %s222_s15, 2  ;;  %s1272_s25 = sshll.u32 %s1722_s22, 6 }
  0x47   : > { %s1911_s6 = scalar_select %p39_p9, %s1714_s20, %s41_s13  }
  0x48   : > { %s1916_s24 = scalar_lea.hbm %s2145_s0, %s1272_s25  ;;  %s226_s27 = scalar_lea.vmem [#allocation4], %s1271_s10 }
  0x49   : > { %s233_s7 = sshll.u32 %s226_s27, 4  ;;  %p1920_p2 = pnand %p1469_p3, %p50_p5  ;;  %s1924_s7 = int_to_ptr.vmem [resolvable:$true] %s233_s7 }
  0x4a   : > { %s223_s11 = scalar_lea.sflag [#allocation5], %s222_s15  ;;  %s1610_s13 = scalar_lea.hbm %s1916_s24, 64 }
  0x4b   : > { %p1611_p11 = scmp.ne.s32.totalorder %s1916_s24, %s1610_s13  ;;  %p1612_p12 = pneg %p1920_p2 }
  0x4c   : > { %s1615_s25 = scalar_lea.hbm %s2145_s0, 128  ;;  %p1616_p4 = scmp.lt.u32.totalorder %s1916_s24, %s2145_s0 }
  0x4d   : > { %p1613_p0 = pnand %p1612_p12, %p1611_p11  ;;  %p1617_p13 = scmp.lt.u32.totalorder %s1615_s25, %s1610_s13 }
  0x4e   : > { %p1619_p10 = scmp.lt.u32.totalorder %s1610_s13, %s1916_s24 }
  0x4f   : > { %p1614_p1 = pneg %p1613_p0  ;;  %p1618_p6 = por %p1617_p13, %p1616_p4 }
  0x51   : > { %p1620_p3 = por %p1619_p10, %p1618_p6 }
  0x53   : > { %p1621_p5 = pnand %p1620_p3, %p1614_p1 }
  0x55   : > { %1624 = shalt.err (!%p1621_p5)
}
  0x56   : > { %s1625_s15 = scalar_lea.vmem %s1924_s7, 64  ;;  %s1732_s27 = smov [#allocation4]  }
  0x57   : > { %p1626_p9 = scmp.ne.s32.totalorder %s1924_s7, %s1625_s15  ;;  %s1630_s14 = sshll.u32 %s1732_s27, 4  ;;  %s1631_s14 = int_to_ptr.vmem [resolvable:$false] %s1630_s14 }
  0x58   : > { %s1632_s10 = scalar_lea.vmem %s1631_s14, 128  ;;  %p1633_p7 = scmp.lt.s32.totalorder %s1924_s7, %s1631_s14 }
  0x59   : > { %p1628_p11 = pnand %p1626_p9, %p1612_p12  ;;  %p1634_p4 = scmp.lt.s32.totalorder %s1632_s10, %s1625_s15 }
  0x5b   : > { %p1629_p0 = pneg %p1628_p11  ;;  %p1635_p13 = por %p1634_p4, %p1633_p7 }
  0x5d   : > { %p1636_p6 = pnand %p1635_p13, %p1629_p0 }
  0x5f   : > { %1639 = shalt.err (!%p1636_p6)
}
  0x60   : > { %1462 = dma.hbm_to_vmem [thread:$0]  (!%p1920_p2), %s1916_s24, 64, %s1924_s7, %s223_s11  }
  0x61   : > { %242 = sbr.rel (%p1823_p8) target bundleno = 2261 (0x8d5), region = 40  ;;  %s1954_s13 = sand.u32 (!%p1823_p8), 1, %s1710_s19  }
  0x62   : > { %s1274_s25 = sshll.u32 (!%p1823_p8), %s1954_s13, 2  ;;  %s245_s16 = scalar_lea.sflag (!%p1823_p8), [#allocation5], %s1954_s13 }
  0x63   : > { %s1958_s17 = scalar_lea.vmem (!%p1823_p8), [#allocation4], %s1274_s25  ;;  %p2163_p7 = scmp.ne.s32.totalorder (!%p1823_p8), %s2157_s28, 0 }
  0x68   : > { %1693 = dma.done.wait (%p2163_p7), %s245_s16, 64  }
  0x69   : > { %1695 = vsyncadd (%p2163_p7), %s245_s16, 4294967232  ;;  %p2164_p2 = scmp.ne.s32.totalorder %s2155_s26, 0 }
  0x6b   : > { %1697 = dma.done.wait (%p2164_p2), [#allocation8], 1024  }
  0x6c   : > { %1699 = vsyncadd (%p2164_p2), [#allocation8], 4294966272  ;;  %v1733_v0 = vmov 0.0   ;;  %vm1734_vm0 = vmmov 0   ;;  %v1530_v1 = vld [vmem:[#allocation7 + $0x10] sm:$0xff]   ;;  %v1531_v2 = vld [vmem:[#allocation7 + $0x18] sm:$0xff]  }
  0x6d   : > { %1344 = vmatprep.subr.bf16.mxu0 %v1733_v0  ;;  %1348 = vmatprep.mubr.msk.bf16.mxu0 %vm1734_vm0, %v1733_v0  ;;  %v1532_v3 = vld [vmem:[#allocation7 + $0x20] sm:$0xff]   ;;  %v1533_v4 = vld [vmem:[#allocation7 + $0x28] sm:$0xff]   ;;  %v288_v5 = vld [vmem:[%s1958_s17] sm:$0xf]  ;;  %vm314_vm1 = vcmask 261120   ;;  %vm424_vm2 = vcmask 257024  }
  0x6e   : > { %1352 = vmatprep.subr.bf16.mxu1 %v1733_v0  ;;  %1356 = vmatprep.mubr.msk.bf16.mxu1 %vm1734_vm0, %v1733_v0  ;;  %v1534_v6 = vld [vmem:[#allocation7] sm:$0xff]   ;;  %v1535_v7 = vld [vmem:[#allocation7 + $0x8] sm:$0xff]   ;;  %v433_v8 = vld [vmem:[%s1958_s17] sm:$0xf]  ;;  %vm508_vm3 = vcmask 64512   ;;  %s1735_s11 = smov 120  }
  0x6f   : > { %1345 = vmatpush3.bf16.msra.mxu0 %v1530_v1  ;;  %1353 = vmatpush3.bf16.msra.mxu1 %v1532_v3  ;;  %v1279_v9 = vld [vmem:[%s2147_s2 + $0x1] ss:$0 sm:$0xff]  ;;  %v1284_v13 = vld [vmem:[%s2147_s2 + $0x2] ss:$0 sm:$0xff]  ;;  %v1288_v23 = vld [vmem:[%s2147_s2] ss:$0 sm:$0xff] }
  0x70   : > { %1346 = vmatprep.subr.bf16.mxu0 %v1733_v0  ;;  %1354 = vmatprep.subr.bf16.mxu1 %v1733_v0  ;;  %s1736_s15 = smov 112   ;;  %vm568_vm4 = vcmask 1043456   ;;  %s1737_s27 = smov 104   ;;  %v504_v60 = vld [vmem:[#allocation9] sm:$0xf] }
  0x71   : > { %v783_v1 = vsel %vm568_vm4, %v504_v60, 0  ;;  %s1277_s14 = sshll.u32 %s1954_s13, 3  ;;  %s1308_s16 = sshll.u32 %s1718_s21, 7 }
  0x72   : > { %s282_s17 = scalar_lea.vmem [#allocation10], %s1277_s14  ;;  %s2095_s24 = scalar_lea.hbm %s2150_s5, %s1308_s16 }
  0x73   : > { %1347 = vmatpush3.bf16.msra.mxu0 %v1531_v2  ;;  %1355 = vmatpush3.bf16.msra.mxu1 %v1533_v4  ;;  %v505_v2 = vld [vmem:[#allocation9 + $0x4] sm:$0xf]  ;;  %s1165_s26 = sshll.u32 %s282_s17, 4  ;;  %s1151_s21 = scalar_lea.sflag [#allocation6], %s1954_s13  ;;  %s2097_s26 = int_to_ptr.vmem [resolvable:$true] %s1165_s26 }
  0x74   : > { %1360 = vmatprep.subr.bf16.mxu0 %v1733_v0  ;;  %1368 = vmatprep.subr.bf16.mxu1 %v1733_v0  ;;  %v737_v3 = vsel %vm568_vm4, %v505_v2, 0  ;;  %s1640_s7 = scalar_lea.vmem %s2097_s26, 128  ;;  %p2165_p12 = scmp.ne.s32.totalorder %s2161_s8, 0 }
  0x75   : > { %p1641_p8 = scmp.ne.s32.totalorder %s2097_s26, %s1640_s7  ;;  %s1738_s9 = smov [#allocation10]  }
  0x76   : > { %1349 = vmatmul.mubr.msk.bf16.vlgmr.msra.gmra.mrb[0].mxu0 %vm314_vm1, %v288_v5  ;;  %1357 = vmatmul.mubr.msk.bf16.vlgmr.msra.gmra.mrb[0].mxu1 %vm314_vm1, %v288_v5 }
  0x77   : > { %1361 = vmatpush3.bf16.msra.mxu0 %v1534_v6  ;;  %1364 = vmatprep.mubr.msk.bf16.mxu0 %vm1734_vm0, %v1733_v0  ;;  %p1642_p1 = pnand %p1641_p8, %p2165_p12 }
  0x78   : > { %1362 = vmatprep.subr.bf16.mxu0 %v1733_v0  ;;  %1370 = vmatprep.mubr.msk.bf16.mxu1 %vm1734_vm0, %v1733_v0 }
  0x79   : > { %p1643_p10 = pneg %p1642_p1 }
  0x7b   : > { %1363 = vmatpush3.bf16.msra.mxu0 %v1535_v7 }
  0x7c   : > { %1374 = vmatprep.subr.bf16.mxu0 %v1733_v0 }
  0x7e   : > { %1365 = vmatmul.mubr.msk.bf16.vlgmr.msra.gmra.mrb[4].mxu0 %vm314_vm1, %v433_v8 }
  0x7f   : > { %1376 = vmatprep.mubr.msk.bf16.mxu0 %vm1734_vm0, %v1733_v0 }
 0x149   : > { %v352_v10 = vpop.f32.mrb[0].mxu0  ;;  %v417_v17 = vpop.f32.mrb[0].mxu1 }
 0x14a   : > { %v353_v11 = vadd.f32 %v1279_v9, %v352_v10  ;;  %v1350_v12 = vpop.f32.mrb[1].mxu0  ;;  %v418_v18 = vadd.f32 %v1284_v13, %v417_v17  ;;  %v1358_v19 = vpop.f32.mrb[1].mxu1 }
 0x14b   : > { %v355_v14 = vpop.f32.mrb[2].mxu0  ;;  %v420_v20 = vpop.f32.mrb[2].mxu1 }
 0x14c   : > { %v423_v15 = vpack.c.bf16 %v353_v11, %v353_v11  ;;  %v1351_v16 = vpop.f32.mrb[3].mxu0  ;;  %v426_v21 = vpack.c.bf16 %v418_v18, %v418_v18  ;;  %v1359_v22 = vpop.f32.mrb[3].mxu1 }
 0x14e   : > { %425 = vst.msk [vmem:[#allocation2] sm:$0xf] %vm424_vm2, %v423_v15  ;;  %427 = vst.msk [vmem:[#allocation3] sm:$0xf] %vm424_vm2, %v426_v21 }
 0x151   : > { %v495_v24 = vpop.f32.mrb[4].mxu0 }
 0x152   : > { %v1366_v25 = vpop.f32.mrb[5].mxu0  ;;  %v496_v27 = vadd.f32 %v1288_v23, %v495_v24 }
 0x153   : > { %v498_v26 = vpop.f32.mrb[6].mxu0 }
 0x154   : > { %v1367_v28 = vpop.f32.mrb[7].mxu0  ;;  %v2003_v32 = vpack.c.bf16 %v496_v27, %v496_v27 }
 0x155   : > { %v502_v29 = vld [vmem:[#allocation2] sm:$0xf]  ;;  %v503_v33 = vld [vmem:[#allocation3] sm:$0xf] }
 0x156   : > { %v513_v30 = vsel %vm508_vm3, %v502_v29, 0  ;;  %v2001_v31 = vcombine.low %v502_v29, %v502_v29  ;;  %v2008_v34 = vcombine.low %v503_v33, %v503_v33  ;;  %v570_v35 = vsel %vm568_vm4, %v503_v33, 0 }
 0x157   : > { %1369 = vmatpush3.bf16.xpose.msra.mxu1 %v513_v30  ;;  %1375 = vmatpush3.bf16.msra.mxu0 %v570_v35 }
 0x158   : > { %621 = vrot.lane.b32.xlu0 %v2001_v31, %s1735_s11  ;;  %1380 = vmatprep.subr.bf16.mxu1 %v1733_v0 }
 0x159   : > { %1386 = vmatprep.subr.bf16.mxu0 %v1733_v0 }
 0x15c   : > { %616 = vrot.lane.b32.xlu0 %v2003_v32, %s1735_s11 }
 0x15e   : > { %1371 = vmatmul.mubr.msk.bf16.vlgmr.msra.gmra.mrb[4].mxu1 %vm508_vm3, %v2003_v32 }
 0x15f   : > { %1382 = vmatprep.mubr.msk.bf16.mxu1 %vm1734_vm0, %v1733_v0 }
 0x160   : > { %682 = vrot.lane.b32.xlu0 %v2008_v34, %s1735_s11  ;;  %s1644_s11 = sshll.u32 %s1738_s9, 4  ;;  %s1645_s11 = int_to_ptr.vmem [resolvable:$false] %s1644_s11 }
 0x161   : > { %p1647_p3 = scmp.lt.s32.totalorder %s2097_s26, %s1645_s11 }
 0x164   : > { %827 = vrot.lane.b32.xlu0 %v2001_v31, %s1736_s15 }
 0x1ca   : > { %v622_v36 = vpop.permute.xlu0 %621 }
 0x1cb   : > { %v627_v37 = vsel %vm508_vm3, %v622_v36, 0 }
 0x1cc   : > { %1381 = vmatpush3.bf16.xpose.msra.mxu1 %v627_v37 }
 0x1cd   : > { %1392 = vmatprep.subr.bf16.mxu1 %v1733_v0 }
 0x1ce   : > { %v617_v38 = vpop.permute.xlu0 %616 }
 0x1d2   : > { %v683_v53 = vpop.permute.xlu0 %682 }
 0x1d3   : > { %1383 = vmatmul.mubr.msk.bf16.vlgmr.msra.gmra.mrb[8].mxu1 %vm508_vm3, %v617_v38  ;;  %v688_v54 = vsel %vm568_vm4, %v683_v53, 0 }
 0x1d4   : > { %1394 = vmatprep.mubr.msk.bf16.mxu1 %vm1734_vm0, %v1733_v0  ;;  %1393 = vmatpush3.bf16.msra.mxu1 %v737_v3 }
 0x1d5   : > { %1404 = vmatprep.subr.bf16.mxu1 %v1733_v0 }
 0x1d6   : > { %v828_v4 = vpop.permute.xlu0 %827 }
 0x1d7   : > { %v833_v23 = vsel %vm508_vm3, %v828_v4, 0 }
 0x231   : > { %v549_v39 = vpop.f32.mrb[4].mxu1 }
 0x232   : > { %v1372_v40 = vpop.f32.mrb[5].mxu1  ;;  %v555_v41 = vsel %vm508_vm3, %v549_v39, -inf }
 0x233   : > { %556 = vmax.xlane.f32.xlu1 %v555_v41  ;;  %v552_v42 = vpop.f32.mrb[6].mxu1 }
 0x234   : > { %v1373_v43 = vpop.f32.mrb[7].mxu1 }
 0x2a6   : > { %v663_v44 = vpop.f32.mrb[8].mxu1 }
 0x2a7   : > { %v1384_v45 = vpop.f32.mrb[9].mxu1  ;;  %v669_v46 = vsel %vm508_vm3, %v663_v44, -inf }
 0x2a8   : > { %670 = vmax.xlane.f32.xlu1 %v669_v46  ;;  %v666_v47 = vpop.f32.mrb[10].mxu1 }
 0x2a9   : > { %v1385_v48 = vpop.f32.mrb[11].mxu1 }
 0x2c0   : > { %v557_v49 = vpop.xlane.xlu1 %556 }
 0x2c1   : > { %v558_v50 = vsub.f32 %v549_v39, %v557_v49  ;;  %v506_v49 = vld [vmem:[#allocation9 + $0x8] sm:$0xf] }
 0x2c3   : > { %v559_v51 = vmul.f32 1.442695, %v558_v50  ;;  %v940_v50 = vsel %vm568_vm4, %v506_v49, 0 }
 0x2c5   : > { %1538 = vpow2.f32 %v559_v51 }
 0x2cf   : > { %v1539_v52 = vpop.eup %1538 }
 0x2d0   : > { %v561_v55 = vsel %vm508_vm3, %v1539_v52, 0.0  ;;  %v564_v56 = vpack.c.bf16 %v1539_v52, %v1539_v52 }
 0x2d1   : > { %562 = vadd.xlane.f32.xlu0 %v561_v55 }
 0x2d2   : > { %1377 = vmatmul.mubr.msk.bf16.vlgmr.msra.gmra.mrb[8].mxu0 %vm508_vm3, %v564_v56 }
 0x2d3   : > { %1387 = vmatpush3.bf16.msra.mxu0 %v688_v54  ;;  %1388 = vmatprep.mubr.msk.bf16.mxu0 %vm1734_vm0, %v1733_v0 }
 0x2d4   : > { %1398 = vmatprep.subr.bf16.mxu0 %v1733_v0 }
 0x2e7   : > { %885 = vrot.lane.b32.xlu0 %v2008_v34, %s1736_s15 }
 0x2eb   : > { %983 = vrot.lane.b32.xlu0 %v2003_v32, %s1737_s27 }
 0x335   : > { %v671_v57 = vpop.xlane.xlu1 %670 }
 0x336   : > { %v672_v58 = vsub.f32 %v663_v44, %v671_v57 }
 0x338   : > { %v673_v59 = vmul.f32 1.442695, %v672_v58 }
 0x33a   : > { %1540 = vpow2.f32 %v673_v59 }
 0x344   : > { %v1541_v61 = vpop.eup %1540 }
 0x345   : > { %v675_v62 = vsel %vm508_vm3, %v1541_v61, 0.0  ;;  %v678_v63 = vpack.c.bf16 %v1541_v61, %v1541_v61 }
 0x346   : > { %676 = vadd.xlane.f32.xlu1 %v675_v62 }
 0x347   : > { %1389 = vmatmul.mubr.msk.bf16.vlgmr.msra.gmra.mrb[12].mxu0 %vm508_vm3, %v678_v63 }
 0x348   : > { %1399 = vmatpush3.bf16.msra.mxu0 %v783_v1  ;;  %1400 = vmatprep.mubr.msk.bf16.mxu0 %vm1734_vm0, %v1733_v0 }
 0x349   : > { %1410 = vmatprep.subr.bf16.mxu0 %v1733_v0 }
 0x357   : > { %825 = vrot.lane.b32.xlu1 %v2003_v32, %s1736_s15  ;;  %s1646_s15 = scalar_lea.vmem %s1645_s11, 256 }
 0x358   : > { %p1648_p5 = scmp.lt.s32.totalorder %s1646_s15, %s1640_s7 }
 0x35a   : > { %p1649_p9 = por %p1648_p5, %p1647_p3 }
 0x35c   : > { %p1650_p11 = pnand %p1649_p9, %p1643_p10 }
 0x35e   : > { %v563_v5 = vpop.xlane.xlu0 %562 }
 0x35f   : > { %1542 = vrcp.f32 %v563_v5 }
 0x362   : > { %v886_v10 = vpop.permute.xlu0 %885 }
 0x363   : > { %v891_v14 = vsel %vm568_vm4, %v886_v10, 0 }
 0x369   : > { %v1543_v6 = vpop.eup %1542 }
 0x3a5   : > { %v606_v7 = vpop.f32.mrb[8].mxu0 }
 0x3a6   : > { %v613_v8 = vmul.f32 %v1543_v6, %v606_v7  ;;  %v1378_v9 = vpop.f32.mrb[9].mxu0 }
 0x3a7   : > { %v609_v11 = vpop.f32.mrb[10].mxu0 }
 0x3a8   : > { %v614_v12 = vpack.c.bf16 %v613_v8, %v613_v8  ;;  %v1379_v13 = vpop.f32.mrb[11].mxu0  ;;  %v507_v8 = vld [vmem:[#allocation9 + $0xc] sm:$0xf] }
 0x3aa   : > { %1401 = vmatmul.mubr.msk.bf16.vlgmr.msra.gmra.mrb[16].mxu0 %vm508_vm3, %v614_v12 }
 0x3ab   : > { %1411 = vmatpush3.bf16.msra.mxu0 %v891_v14  ;;  %1412 = vmatprep.mubr.msk.bf16.mxu0 %vm1734_vm0, %v1733_v0 }
 0x3ac   : > { %1422 = vmatprep.subr.bf16.mxu0 %v1733_v0 }
 0x3d3   : > { %v677_v15 = vpop.xlane.xlu1 %676 }
 0x3d4   : > { %1544 = vrcp.f32 %v677_v15 }
 0x3d7   : > { %v826_v24 = vpop.permute.xlu1 %825 }
 0x3de   : > { %v1545_v16 = vpop.eup %1544 }
 0x41a   : > { %v724_v17 = vpop.f32.mrb[12].mxu0 }
 0x41b   : > { %v731_v18 = vmul.f32 %v1545_v16, %v724_v17  ;;  %v1390_v19 = vpop.f32.mrb[13].mxu0 }
 0x41c   : > { %v727_v20 = vpop.f32.mrb[14].mxu0 }
 0x41d   : > { %v732_v21 = vpack.c.bf16 %v731_v18, %v731_v18  ;;  %v1391_v22 = vpop.f32.mrb[15].mxu0 }
 0x41f   : > { %1395 = vmatmul.mubr.msk.bf16.vlgmr.msra.gmra.mrb[12].mxu1 %vm508_vm3, %v732_v21 }
 0x420   : > { %1405 = vmatpush3.bf16.xpose.msra.mxu1 %v833_v23  ;;  %1406 = vmatprep.mubr.msk.bf16.mxu1 %vm1734_vm0, %v1733_v0  ;;  %v1306_v23 = vld [vmem:[%s2149_s4] ss:$0 sm:$0xff] }
 0x421   : > { %1416 = vmatprep.subr.bf16.mxu1 %v1733_v0 }
 0x427   : > { %1407 = vmatmul.mubr.msk.bf16.vlgmr.msra.gmra.mrb[16].mxu1 %vm508_vm3, %v826_v24 }
 0x428   : > { %1418 = vmatprep.mubr.msk.bf16.mxu1 %vm1734_vm0, %v1733_v0  ;;  %1417 = vmatpush3.bf16.msra.mxu1 %v940_v50 }
 0x429   : > { %1428 = vmatprep.subr.bf16.mxu1 %v1733_v0 }
 0x47d   : > { %v819_v25 = vpop.f32.mrb[16].mxu0 }
 0x47e   : > { %v1402_v26 = vpop.f32.mrb[17].mxu0 }
 0x47f   : > { %v822_v27 = vpop.f32.mrb[18].mxu0 }
 0x480   : > { %v1403_v28 = vpop.f32.mrb[19].mxu0 }
 0x4f2   : > { %v773_v29 = vpop.f32.mrb[12].mxu1 }
 0x4f3   : > { %v2059_v30 = vadd.f32 %v819_v25, %v773_v29  ;;  %v1396_v32 = vpop.f32.mrb[13].mxu1 }
 0x4f4   : > { %v776_v33 = vpop.f32.mrb[14].mxu1 }
 0x4f5   : > { %v1397_v35 = vpop.f32.mrb[15].mxu1 }
 0x4fa   : > { %v869_v36 = vpop.f32.mrb[16].mxu1 }
 0x4fb   : > { %v1408_v37 = vpop.f32.mrb[17].mxu1  ;;  %v875_v38 = vsel %vm508_vm3, %v869_v36, -inf }
 0x4fc   : > { %876 = vmax.xlane.f32.xlu1 %v875_v38  ;;  %v872_v39 = vpop.f32.mrb[18].mxu1 }
 0x4fd   : > { %v1409_v40 = vpop.f32.mrb[19].mxu1 }
 0x50d   : > { %985 = vrot.lane.b32.xlu1 %v2001_v31, %s1737_s27  ;;  %v984_v31 = vpop.permute.xlu0 %983 }
 0x589   : > { %v877_v41 = vpop.xlane.xlu1 %876 }
 0x58a   : > { %v878_v42 = vsub.f32 %v869_v36, %v877_v41 }
 0x58c   : > { %v879_v43 = vmul.f32 1.442695, %v878_v42 }
 0x58d   : > { %v986_v45 = vpop.permute.xlu1 %985 }
 0x58e   : > { %1546 = vpow2.f32 %v879_v43  ;;  %v991_v48 = vsel %vm508_vm3, %v986_v45, 0 }
 0x598   : > { %v1547_v44 = vpop.eup %1546 }
 0x599   : > { %v881_v46 = vsel %vm508_vm3, %v1547_v44, 0.0  ;;  %v884_v47 = vpack.c.bf16 %v1547_v44, %v1547_v44 }
 0x59a   : > { %882 = vadd.xlane.f32.xlu0 %v881_v46 }
 0x59b   : > { %1413 = vmatmul.mubr.msk.bf16.vlgmr.msra.gmra.mrb[20].mxu0 %vm508_vm3, %v884_v47 }
 0x59c   : > { %1423 = vmatpush3.bf16.xpose.msra.mxu0 %v991_v48  ;;  %1424 = vmatprep.mubr.msk.bf16.mxu0 %vm1734_vm0, %v1733_v0 }
 0x59d   : > { %1434 = vmatprep.subr.bf16.mxu0 %v1733_v0 }
 0x5a3   : > { %1425 = vmatmul.mubr.msk.bf16.vlgmr.msra.gmra.mrb[24].mxu0 %vm508_vm3, %v984_v31 }
 0x5a4   : > { %1436 = vmatprep.mubr.msk.bf16.mxu0 %vm1734_vm0, %v1733_v0 }
 0x5b0   : > { %1043 = vrot.lane.b32.xlu0 %v2008_v34, %s1737_s27 }
 0x627   : > { %v883_v51 = vpop.xlane.xlu0 %882 }
 0x628   : > { %1548 = vrcp.f32 %v883_v51 }
 0x62b   : > { %v1044_v56 = vpop.permute.xlu0 %1043 }
 0x62c   : > { %v1049_v60 = vsel %vm568_vm4, %v1044_v56, 0 }
 0x632   : > { %v1549_v52 = vpop.eup %1548 }
 0x66e   : > { %v927_v53 = vpop.f32.mrb[20].mxu0 }
 0x66f   : > { %v934_v54 = vmul.f32 %v1549_v52, %v927_v53  ;;  %v1414_v55 = vpop.f32.mrb[21].mxu0 }
 0x670   : > { %v930_v57 = vpop.f32.mrb[22].mxu0 }
 0x671   : > { %v935_v58 = vpack.c.bf16 %v934_v54, %v934_v54  ;;  %v1415_v59 = vpop.f32.mrb[23].mxu0 }
 0x673   : > { %1419 = vmatmul.mubr.msk.bf16.vlgmr.msra.gmra.mrb[20].mxu1 %vm508_vm3, %v935_v58 }
 0x674   : > { %1429 = vmatpush3.bf16.msra.mxu1 %v1049_v60  ;;  %1430 = vmatprep.mubr.msk.bf16.mxu1 %vm1734_vm0, %v1733_v0  ;;  %v1098_v0 = vsel %vm568_vm4, %v507_v8, 0 }
 0x675   : > { %1435 = vmatpush3.bf16.msra.mxu0 %v1098_v0 }
 0x676   : > { %v1027_v34 = vpop.f32.mrb[24].mxu0 }
 0x677   : > { %v1426_v61 = vpop.f32.mrb[25].mxu0  ;;  %v1033_v62 = vsel %vm508_vm3, %v1027_v34, -inf }
 0x678   : > { %1034 = vmax.xlane.f32.xlu1 %v1033_v62  ;;  %v1030_v63 = vpop.f32.mrb[26].mxu0 }
 0x679   : > { %v1427_v1 = vpop.f32.mrb[27].mxu0 }
 0x705   : > { %v1035_v2 = vpop.xlane.xlu1 %1034 }
 0x706   : > { %v1036_v3 = vsub.f32 %v1027_v34, %v1035_v2 }
 0x708   : > { %v1037_v4 = vmul.f32 1.442695, %v1036_v3 }
 0x70a   : > { %1550 = vpow2.f32 %v1037_v4 }
 0x714   : > { %v1551_v5 = vpop.eup %1550 }
 0x715   : > { %v1039_v6 = vsel %vm508_vm3, %v1551_v5, 0.0  ;;  %v1042_v7 = vpack.c.bf16 %v1551_v5, %v1551_v5 }
 0x716   : > { %1040 = vadd.xlane.f32.xlu1 %v1039_v6 }
 0x717   : > { %1431 = vmatmul.mubr.msk.bf16.vlgmr.msra.gmra.mrb[24].mxu1 %vm508_vm3, %v1042_v7 }
 0x746   : > { %v976_v9 = vpop.f32.mrb[20].mxu1 }
 0x747   : > { %v982_v10 = vadd.f32 %v976_v9, %v2059_v30  ;;  %v1420_v11 = vpop.f32.mrb[21].mxu1 }
 0x748   : > { %v979_v12 = vpop.f32.mrb[22].mxu1 }
 0x749   : > { %v1421_v13 = vpop.f32.mrb[23].mxu1 }
 0x7a3   : > { %v1041_v14 = vpop.xlane.xlu1 %1040 }
 0x7a4   : > { %1552 = vrcp.f32 %v1041_v14 }
 0x7ae   : > { %v1553_v15 = vpop.eup %1552 }
 0x7ea   : > { %v1085_v16 = vpop.f32.mrb[24].mxu1 }
 0x7eb   : > { %v1092_v17 = vmul.f32 %v1553_v15, %v1085_v16  ;;  %v1432_v18 = vpop.f32.mrb[25].mxu1 }
 0x7ec   : > { %v1088_v19 = vpop.f32.mrb[26].mxu1 }
 0x7ed   : > { %v1093_v20 = vpack.c.bf16 %v1092_v17, %v1092_v17  ;;  %v1433_v21 = vpop.f32.mrb[27].mxu1 }
 0x7ef   : > { %1437 = vmatmul.mubr.msk.bf16.vlgmr.msra.gmra.mrb[28].mxu0 %vm508_vm3, %v1093_v20 }
 0x8c2   : > { %v1134_v22 = vpop.f32.mrb[28].mxu0 }
 0x8c3   : > { %v1140_v24 = vadd.f32 %v1134_v22, %v982_v10  ;;  %v1438_v25 = vpop.f32.mrb[29].mxu0 }
 0x8c4   : > { %v1137_v26 = vpop.f32.mrb[30].mxu0 }
 0x8c5   : > { %v1148_v27 = vadd.f32 %v1306_v23, %v1140_v24  ;;  %v1439_v28 = vpop.f32.mrb[31].mxu0 }
 0x8c7   : > { %1149 = vst.msk [vmem:[%s282_s17] sm:$0xff] %vm314_vm1, %v1148_v27 }
 0x8c8   : > { %1653 = shalt.err (!%p1650_p11)
}
 0x8c9   : > { %s1654_s13 = scalar_lea.hbm %s2095_s24, 128  ;;  %s1658_s10 = scalar_lea.hbm %s2150_s5, 256 }
 0x8ca   : > { %p1655_p0 = scmp.ne.s32.totalorder %s2095_s24, %s1654_s13  ;;  %p1659_p6 = scmp.lt.u32.totalorder %s2095_s24, %s2150_s5 }
 0x8cb   : > { %p1660_p7 = scmp.lt.u32.totalorder %s1658_s10, %s1654_s13  ;;  %p1662_p8 = scmp.lt.u32.totalorder %s1654_s13, %s2095_s24 }
 0x8cc   : > { %p1656_p4 = pnand %p1655_p0, %p2165_p12 }
 0x8cd   : > { %p1661_p2 = por %p1660_p7, %p1659_p6 }
 0x8ce   : > { %p1657_p13 = pneg %p1656_p4 }
 0x8cf   : > { %p1663_p1 = por %p1662_p8, %p1661_p2 }
 0x8d1   : > { %p1664_p10 = pnand %p1663_p1, %p1657_p13 }
 0x8d3   : > { %1667 = shalt.err (!%p1664_p10)
}
 0x8d4   : > { %1450 = dma.vmem_to_hbm [thread:$0]  (%p2165_p12), %s2097_s26, 128, %s2095_s24, %s1151_s21  }
 0x8d5 PF: > { %s1177_s17 = sand.u32 1, %s1706_s18   ;;  %p2166_p3 = scmp.ne.s32.totalorder %s2158_s29, 0 }
 0x8d6   : > { %p2167_p5 = scmp.ge.s32.totalorder %s1726_s23, 2  ;;  %s1178_s28 = scalar_lea.sflag [#allocation6], %s1177_s17 }
 0x8d8   : > { %p1464_p9 = pnand %p2167_p5, %p2166_p3 }
 0x8da   : > { %1701 = dma.done.wait (!%p1464_p9), %s1178_s28, 128  }
 0x8db   : > { %1703 = vsyncadd (!%p1464_p9), %s1178_s28, 4294967168  ;;  %s22_s23 = sadd.s32 1, %s1726_s23   ;;  %s2168_s18 = smov %s1710_s19 }
 0x8dc   : > { %p19_p11 = scmp.ge.s32.totalorder %s22_s23, 4   ;;  %s2169_s19 = smov %s1714_s20 }
 0x8dd   : > { %s2170_s20 = smov %s1911_s6  ;;  %s2171_s21 = smov %s1722_s22 }
 0x8de   : > { %s2172_s22 = smov %s2174_s12  ;;  %21 = sbr.rel (!%p19_p11) target bundleno = 7 (0x7), region = 102 }
 0x8e5   :  { %1183 = vsyncpa [#allocation5], 1 }
 0x8e6   :  { %1185 = vsyncpa [#allocation5 + $0x1], 1 }
 0x8e7   :  { %1186 = vsyncpa [#allocation8], 1 }
 0x8e8   :  { %1187 = vsyncpa [#allocation6], 1 }
 0x8e9   :  { %1189 = vsyncpa [#allocation6 + $0x1], 1 }

</bundles_post_ra>
